<compile_context>
chip_gen: v5e
topology: v5e:2x2
jax: 0.10.0
libtpu: 0.0.40
codegen_flags: <defaults>
</compile_context>

<pallas_src>
import functools

import jax
import jax.numpy as jnp
from jax.experimental import pallas as pl
from jax.experimental.pallas import tpu as pltpu


def _round_up(v, mult):
    return (v + mult - 1) // mult * mult


def _masked_max_kernel(x_ref, m_ref, o_ref, acc_ref, *, tile_n, n_total,
                       mask_rows, acc_rows):
    """One (batch-block b, D-block d, reduction-tile k) grid step.

    x_ref  : (Bb, TN, TD) VMEM tile
    m_ref  : (Bb, TN, 1)  VMEM tile (lane-broadcast over D)
    o_ref  : (Bb, 1, TD)  output tile, resident across k
    acc_ref: (Bb, acc_rows, TD) running-max scratch (input dtype; max is exact)
    """
    k = pl.program_id(2)
    last_k = pl.num_programs(2) - 1

    # Init the running max at the first reduction step.
    @pl.when(k == 0)
    def _():
        acc_ref[...] = jnp.full(acc_ref.shape, -jnp.inf, dtype=acc_ref.dtype)

    # Multiply in the input dtype (exactly torch's `x = x * m`).
    xm = x_ref[...] * m_ref[...]                       # (Bb, TN, TD)

    def accumulate(vals):
        if acc_rows == 8:
            bb, tn, td = vals.shape
            # Elementwise max across the TN/8 vreg rows (VPU only); the 8->1
            # cross-sublane XLU collapse is deferred to the final writeback.
            part = jnp.max(vals.reshape(bb, tn // 8, 8, td), axis=1)
        else:
            part = jnp.max(vals, axis=1, keepdims=True)
        acc_ref[...] = jnp.maximum(acc_ref[...], part)

    if mask_rows:
        # Only the last reduction tile can be partial; full tiles pay zero
        # masking cost (no iota/cmp/select on the hot path).
        @pl.when(k != last_k)
        def _():
            accumulate(xm)

        @pl.when(k == last_k)
        def _():
            row = jax.lax.broadcasted_iota(jnp.int32, xm.shape, dimension=1)
            valid = row < (n_total - k * tile_n)
            neg_inf = jnp.asarray(-jnp.inf, dtype=xm.dtype)
            accumulate(jnp.where(valid, xm, neg_inf))
    else:
        accumulate(xm)

    # Write back once per (batch-block, D-block), after the last reduction tile.
    @pl.when(k == last_k)
    def _():
        o_ref[...] = jnp.max(acc_ref[...], axis=1, keepdims=True).astype(o_ref.dtype)


def masked_max(x: jax.Array, m: jax.Array, *, tile_n=None,
               block_bytes=8 * 1024 * 1024) -> jax.Array:
    """Masked max over dim 1: max(x * m, axis=1, keepdims=True).

    Args:
        x: (B, N, D) floating-point array.
        m: (B, N, 1) mask (cast to x.dtype).
        tile_n: optional override for the N-tile size.
        block_bytes: target bytes per x block (8 MiB is safe on all TPU
            generations incl. v7x; 16 MiB also fine on v5e/v6e).
    Returns:
        (B, 1, D), dtype of x.
    """
    B, N, D = x.shape
    assert m.shape == (B, N, 1), f"mask shape {m.shape} != {(B, N, 1)}"
    assert jnp.issubdtype(x.dtype, jnp.floating), "masked_max requires float x"
    m = m.astype(x.dtype)

    itemsize = jnp.dtype(x.dtype).itemsize

    # D-tiling only exists to hand >=2 parallel work units to v7x's two
    # TensorCores when B == 1; otherwise keep D whole (lane-dense output).
    if B == 1 and D % 256 == 0:
        td, num_d = D // 2, 2
    else:
        td, num_d = D, 1

    row_bytes = _round_up(td, 128) * itemsize

    if tile_n is None:
        # Size the N-tile so one x block is ~block_bytes (the pipeline
        # double-buffers it).  No artificial row cap: bigger blocks = fewer
        # grid steps and larger DMAs on this HBM-bound kernel.
        rows = max(8, (block_bytes // row_bytes) // 8 * 8)
        tile_n = N if rows >= N else rows
    else:
        tile_n = N if tile_n >= N else min(_round_up(tile_n, 8), N)

    num_k = pl.cdiv(N, tile_n)
    mask_rows = (N % tile_n) != 0

    # Batch blocking: when the whole N fits in one tile with budget to spare,
    # pack several batch rows per block so each grid step still moves ~block_bytes.
    Bb = 1
    if num_k == 1 and B > 1:
        per_batch_bytes = _round_up(N, 8) * row_bytes
        max_bb = max(1, block_bytes // max(per_batch_bytes, 1))
        for cand in range(min(B, max_bb), 0, -1):
            if B % cand == 0:
                Bb = cand
                break

    # Sublane-wide accumulator only when the tile height is 8-aligned
    # (it always is unless tile_n == N with N % 8 != 0).
    acc_rows = 8 if tile_n % 8 == 0 else 1

    kernel = functools.partial(
        _masked_max_kernel, tile_n=tile_n, n_total=N,
        mask_rows=mask_rows, acc_rows=acc_rows)

    return pl.pallas_call(
        kernel,
        out_shape=jax.ShapeDtypeStruct((B, 1, D), x.dtype),
        grid_spec=pltpu.PrefetchScalarGridSpec(
            num_scalar_prefetch=0,
            grid=(B // Bb, num_d, num_k),
            in_specs=[
                pl.BlockSpec((Bb, tile_n, td), lambda b, d, k: (b, k, d)),
                pl.BlockSpec((Bb, tile_n, 1), lambda b, d, k: (b, k, 0)),
            ],
            out_specs=pl.BlockSpec((Bb, 1, td), lambda b, d, k: (b, 0, d)),
            scratch_shapes=[pltpu.VMEM((Bb, acc_rows, td), x.dtype)],
        ),
        compiler_params=pltpu.CompilerParams(
            dimension_semantics=("parallel", "parallel", "arbitrary"),
            # Explicit limit: v5e's scoped default is only 16 MiB; 48 MiB is
            # still safe on v7x's 64 MiB physical VMEM.
            vmem_limit_bytes=48 * 1024 * 1024,
        ),
    )(x, m)


def masked_max_ref(x, m):
    return jnp.max(x * m, axis=1, keepdims=True)


if __name__ == "__main__":
    key = jax.random.PRNGKey(0)
    k1, k2, k3, k4, k5, k6 = jax.random.split(key, 6)

    # 1) Module-convention shapes: batch=2, seq=8, hidden=32 (single-tile +
    #    batch-blocking path).
    B, N, D = 2, 8, 32
    x = jax.random.normal(k1, (B, N, D), dtype=jnp.float32)
    m = (jax.random.uniform(k2, (B, N, 1)) > 0.3).astype(jnp.float32)
    out = jax.block_until_ready(masked_max(x, m))
    ref = masked_max_ref(x, m)
    assert out.shape == (B, 1, D)
    assert jnp.allclose(out, ref, atol=1e-6, rtol=1e-6), "mismatch vs reference"

    # 2) Tiled-reduction path: multiple N tiles + a partial last tile
    #    (exercises the pl.when-gated -inf masking).
    B2, N2, D2 = 2, 20, 32
    x2 = jax.random.normal(k3, (B2, N2, D2), dtype=jnp.float32)
    m2 = (jax.random.uniform(k4, (B2, N2, 1)) > 0.3).astype(jnp.float32)
    out2 = jax.block_until_ready(masked_max(x2, m2, tile_n=8))
    ref2 = masked_max_ref(x2, m2)
    assert out2.shape == (B2, 1, D2)
    assert jnp.allclose(out2, ref2, atol=1e-6, rtol=1e-6), "mismatch vs reference (tiled)"

    # 3) bf16 input + B==1 D-split path (two 'parallel' D blocks for v7x).
    B3, N3, D3 = 1, 16, 256
    x3 = jax.random.normal(k5, (B3, N3, D3), dtype=jnp.bfloat16)
    m3 = (jax.random.uniform(k6, (B3, N3, 1)) > 0.3).astype(jnp.bfloat16)
    out3 = jax.block_until_ready(masked_max(x3, m3))
    ref3 = masked_max_ref(x3, m3)
    assert out3.shape == (B3, 1, D3)
    assert jnp.allclose(out3.astype(jnp.float32), ref3.astype(jnp.float32),
                        atol=1e-6, rtol=1e-6), "mismatch vs reference (bf16)"

    print("KERNEL_OK")
</pallas_src>

<mosaic_0001>
module attributes {stable_mosaic.version = 11 : i64} {
  func.func @_masked_max_kernel(%arg0: i32, %arg1: i32, %arg2: i32, %arg3: memref<2x8x32xf32, #tpu.memory_space<vmem>>, %arg4: memref<2x8x1xf32, #tpu.memory_space<vmem>>, %arg5: memref<2x1x32xf32, #tpu.memory_space<vmem>>, %arg6: memref<2x8x32xf32, #tpu.memory_space<vmem>>) attributes {dimension_semantics = [#tpu.dimension_semantics<parallel>, #tpu.dimension_semantics<parallel>, #tpu.dimension_semantics<arbitrary>], iteration_bounds = array<i64: 1, 1, 1>, scalar_prefetch = 0 : i64, scratch_operands = 1 : i64, tpu.core_type = #tpu.core_type<tc>, window_params = [{transform_indices = @transform_0, window_bounds = array<i64: 2, 8, 32>}, {transform_indices = @transform_1, window_bounds = array<i64: 2, 8, 1>}, {transform_indices = @transform_2, window_bounds = array<i64: 2, 1, 32>}]} {
    %c0_i32 = arith.constant 0 : i32
    %0 = arith.cmpi eq, %arg2, %c0_i32 : i32
    %1 = arith.extui %0 : i1 to i32
    %c0_i32_0 = arith.constant 0 : i32
    %2 = arith.cmpi ne, %1, %c0_i32_0 : i32
    scf.if %2 {
      %cst_14 = arith.constant 0xFF800000 : f32
      %15 = vector.broadcast %cst_14 : f32 to vector<2x8x32xf32>
      %c0_15 = arith.constant 0 : index
      %c0_16 = arith.constant 0 : index
      %c0_17 = arith.constant 0 : index
      %16 = vector.load %arg6[%c0_15, %c0_16, %c0_17] : memref<2x8x32xf32, #tpu.memory_space<vmem>>, vector<2x8x32xf32>
      tpu.vector_store %arg6[%c0_15, %c0_16, %c0_17], %15 {strides = array<i32>} : memref<2x8x32xf32, #tpu.memory_space<vmem>>, vector<2x8x32xf32>,
    } else {
    }
    %c0 = arith.constant 0 : index
    %c0_1 = arith.constant 0 : index
    %c0_2 = arith.constant 0 : index
    %3 = vector.load %arg3[%c0, %c0_1, %c0_2] : memref<2x8x32xf32, #tpu.memory_space<vmem>>, vector<2x8x32xf32>
    %c0_3 = arith.constant 0 : index
    %c0_4 = arith.constant 0 : index
    %c0_5 = arith.constant 0 : index
    %4 = vector.load %arg4[%c0_3, %c0_4, %c0_5] : memref<2x8x1xf32, #tpu.memory_space<vmem>>, vector<2x8x1xf32>
    %5 = vector.broadcast %4 : vector<2x8x1xf32> to vector<2x8x32xf32>
    %6 = arith.mulf %3, %5 : vector<2x8x32xf32>
    %7 = vector.shape_cast %6 : vector<2x8x32xf32> to vector<2x1x8x32xf32>
    %cst = arith.constant dense<0xFF800000> : vector<2x8x32xf32>
    %8 = vector.multi_reduction <maximumf>, %7, %cst [1] : vector<2x1x8x32xf32> to vector<2x8x32xf32>
    %c0_6 = arith.constant 0 : index
    %c0_7 = arith.constant 0 : index
    %c0_8 = arith.constant 0 : index
    %9 = vector.load %arg6[%c0_6, %c0_7, %c0_8] : memref<2x8x32xf32, #tpu.memory_space<vmem>>, vector<2x8x32xf32>
    %10 = arith.maximumf %9, %8 : vector<2x8x32xf32>
    %c0_9 = arith.constant 0 : index
    %c0_10 = arith.constant 0 : index
    %c0_11 = arith.constant 0 : index
    %11 = vector.load %arg6[%c0_9, %c0_10, %c0_11] : memref<2x8x32xf32, #tpu.memory_space<vmem>>, vector<2x8x32xf32>
    tpu.vector_store %arg6[%c0_9, %c0_10, %c0_11], %10 {strides = array<i32>} : memref<2x8x32xf32, #tpu.memory_space<vmem>>, vector<2x8x32xf32>,
    %c0_i32_12 = arith.constant 0 : i32
    %12 = arith.cmpi eq, %arg2, %c0_i32_12 : i32
    %13 = arith.extui %12 : i1 to i32
    %c0_i32_13 = arith.constant 0 : i32
    %14 = arith.cmpi ne, %13, %c0_i32_13 : i32
    scf.if %14 {
      %c0_14 = arith.constant 0 : index
      %c0_15 = arith.constant 0 : index
      %c0_16 = arith.constant 0 : index
      %15 = vector.load %arg6[%c0_14, %c0_15, %c0_16] : memref<2x8x32xf32, #tpu.memory_space<vmem>>, vector<2x8x32xf32>
      %cst_17 = arith.constant dense<0xFF800000> : vector<2x32xf32>
      %16 = vector.multi_reduction <maximumf>, %15, %cst_17 [1] : vector<2x8x32xf32> to vector<2x32xf32>
      %17 = vector.shape_cast %16 : vector<2x32xf32> to vector<2x1x32xf32>
      %c0_18 = arith.constant 0 : index
      %c0_19 = arith.constant 0 : index
      %c0_20 = arith.constant 0 : index
      %18 = vector.load %arg5[%c0_18, %c0_19, %c0_20] : memref<2x1x32xf32, #tpu.memory_space<vmem>>, vector<2x1x32xf32>
      tpu.vector_store %arg5[%c0_18, %c0_19, %c0_20], %17 {strides = array<i32>} : memref<2x1x32xf32, #tpu.memory_space<vmem>>, vector<2x1x32xf32>,
    } else {
    }
    return
  }
  func.func @transform_0(%arg0: i32, %arg1: i32, %arg2: i32) -> (i32, i32, i32) {
    %c0_i32 = arith.constant 0 : i32
    return %arg0, %arg2, %arg1 : i32, i32, i32
  }
  func.func @transform_1(%arg0: i32, %arg1: i32, %arg2: i32) -> (i32, i32, i32) {
    %c0_i32 = arith.constant 0 : i32
    %c0_i32_0 = arith.constant 0 : i32
    return %arg0, %arg2, %c0_i32 : i32, i32, i32
  }
  func.func @transform_2(%arg0: i32, %arg1: i32, %arg2: i32) -> (i32, i32, i32) {
    %c0_i32 = arith.constant 0 : i32
    %c0_i32_0 = arith.constant 0 : i32
    return %arg0, %c0_i32, %arg1 : i32, i32, i32
  }
}

</mosaic_0001>

<bundles_post_ra>
// kernel: tpu_custom_call.1
= control target key start
LH: loop header
LB: loop body
LE: loop exit
PB: predicated region body
PF: predicated region fallthrough
CT: control target
= control target key end

     0   :  { %s155_s0 = inlined_call_operand.vmem [shape: f32[2,8,32], index: 0, kind: input, shape index: {}]   ;;  %s156_s1 = inlined_call_operand.vmem [shape: f32[2,8,1], index: 1, kind: input, shape index: {}]   ;;  %s157_s2 = inlined_call_operand.hbm [shape: f32[2,1,32], index: 2, kind: output, shape index: {}]  }
   0x1   :  { %v21_v0 = vld [vmem:[%s156_s1] sm:$0xff] }
   0x2   :  { %7 = vsyncpa [#allocation4], 0  ;;  %v114_v1 = vmov 0   ;;  %v22_v2 = vld [vmem:[%s156_s1 + $0x8] sm:$0xff]  ;;  %vm16_vm0 = vcmask 261120   ;;  %v115_v3 = vmov -inf  }
   0x3   :  { %87 = vset.pattern.permute.xlu0 %v114_v1  ;;  %17 = vst.msk [vmem:[#allocation2] sm:$0xff] %vm16_vm0, %v115_v3  ;;  %v19_v4 = vld [vmem:[%s155_s0] sm:$0xff]  ;;  %v20_v9 = vld [vmem:[%s155_s0 + $0x8] sm:$0xff]  ;;  %vm61_vm1 = vcmask 253952   ;;  %s116_s0 = smov [#allocation3]   ;;  %s70_s19 = sshll.u32 %s157_s2, 4  ;;  %s71_s19 = int_to_ptr.hbm [resolvable:$true] %s70_s19 }
   0x4   :  { %25 = vperm.xlu0 %87, %v21_v0   ;;  %18 = vst.msk [vmem:[#allocation2 + $0x8] sm:$0xff] %vm16_vm0, %v115_v3  ;;  %s68_s1 = sshll.u32 %s116_s0, 4  ;;  %s117_s20 = smov 16   ;;  %s69_s1 = int_to_ptr.vmem [resolvable:$true] %s68_s1 }
   0x5   :  { %s118_s21 = smov 1  }
   0xa   :  { %v35_v6 = vld [vmem:[#allocation2] sm:$0xff] }
   0xb   :  { %v36_v11 = vld [vmem:[#allocation2 + $0x8] sm:$0xff] }
   0xc   :  { %30 = vperm.xlu0 %87, %v22_v2  }
  0x76   :  { %v26_v5 = vpop.permute.xlu0 %25 }
  0x77   :  { %v33_v7 = vmul.f32 %v26_v5, %v19_v4 }
  0x79   :  { %v37_v8 = vmax.f32 %v35_v6, %v33_v7 }
  0x7b   :  { %40 = vst.msk [vmem:[#allocation2] sm:$0xff] %vm16_vm0, %v37_v8 }
  0x7e   :  { %v31_v10 = vpop.permute.xlu0 %30 }
  0x7f   :  { %v34_v12 = vmul.f32 %v31_v10, %v20_v9 }
  0x81   :  { %v38_v13 = vmax.f32 %v36_v11, %v34_v12 }
  0x82   :  { %v45_v14 = vld [vmem:[#allocation2] sm:$0xff] }
  0x83   :  { %41 = vst.msk [vmem:[#allocation2 + $0x8] sm:$0xff] %vm16_vm0, %v38_v13  ;;  %v47_v15 = vsel %vm16_vm0, %v45_v14, -inf }
  0x84   :  { %v48_v16 = vrot.slane %v47_v15, 4 }
  0x86   :  { %v49_v17 = vmax.f32 %v47_v15, %v48_v16 }
  0x88   :  { %v50_v18 = vrot.slane %v49_v17, 2 }
  0x8a   :  { %v46_v19 = vld [vmem:[#allocation2 + $0x8] sm:$0xff]  ;;  %v51_v20 = vmax.f32 %v49_v17, %v50_v18 }
  0x8b   :  { %v54_v21 = vsel %vm16_vm0, %v46_v19, -inf }
  0x8c   :  { %v52_v22 = vrot.slane %v51_v20, 1  ;;  %v55_v23 = vrot.slane %v54_v21, 4 }
  0x8e   :  { %v53_v24 = vmax.f32 %v51_v20, %v52_v22  ;;  %v56_v25 = vmax.f32 %v54_v21, %v55_v23 }
  0x90   :  { %v57_v26 = vrot.slane %v56_v25, 2  ;;  %62 = vst.msk [vmem:[#allocation3] sm:$0x1] %vm61_vm1, %v53_v24 }
  0x92   :  { %v58_v27 = vmax.f32 %v56_v25, %v57_v26 }
  0x94   :  { %v59_v28 = vrot.slane %v58_v27, 1 }
  0x96   :  { %v60_v29 = vmax.f32 %v58_v27, %v59_v28 }
  0x98   :  { %63 = vst.msk [vmem:[#allocation3 + $0x1] sm:$0x1] %vm61_vm1, %v60_v29 }
  0x99   :  { %76 = dma.vmem_to_hbm [thread:$0]  %s69_s1, 32, %s71_s19, [#allocation4], %s117_s20, %s117_s20, %s118_s21  }
  0x9a   :  { %112 = dma.done.wait [#allocation4], 32  }
  0x9b   :  { %113 = vsyncadd [#allocation4], 4294967264 }
  0x9c   :  { %81 = vsyncpa [#allocation4], 1 }

</bundles_post_ra>
